<compile_context>
chip_gen: v5e
topology: v5e:2x2
jax: 0.10.0
libtpu: 0.0.40
codegen_flags: <defaults>
</compile_context>

<pallas_src>
import functools

import jax
import jax.numpy as jnp
from jax.experimental import pallas as pl
from jax.experimental.pallas import tpu as pltpu

OUT_W = 128  # lane-dense output / slab width


def _round_up(x, m):
    return ((x + m - 1) // m) * m


def _cdiv(a, b):
    return -(-a // b)


# ---------------------------------------------------------------------------
# Kernel
# ---------------------------------------------------------------------------
def ddqn_kernel(x_ref, w_ref, b_ref, out_ref, *, ns_pad, hidden):
    # x_ref   : (tb, ns_pad)       state tile (f32 or bf16)
    # w_ref   : (4, R, 128)        [0]=W1 (rows :ns_pad), [1]=W2, [2]=[Wv1|Wa1],
    #                              [3]=dueling-folded head weight Wc (cols :n_actions)
    # b_ref   : (4, 128) f32       rows: b1, b2, [bv1|ba1], bc (zero padded)
    # out_ref : (tb, 128) f32      q in columns :n_actions, zeros elsewhere
    wdt = w_ref.dtype
    x = x_ref[...]

    # trunk layer 1 + ReLU  (static sublane/lane-aligned slice of the padded W1)
    h = jnp.dot(x, w_ref[0][:ns_pad, :hidden], preferred_element_type=jnp.float32)
    h = jnp.maximum(h + b_ref[0:1, :hidden], 0.0)

    # trunk layer 2 + ReLU
    h = jnp.dot(h.astype(wdt), w_ref[1][:hidden, :hidden],
                preferred_element_type=jnp.float32)
    h = jnp.maximum(h + b_ref[1:2, :hidden], 0.0)

    # fused head layer 1:  [v_h | a_h] = relu(h @ [Wv1 | Wa1] + [bv1 | ba1])
    g = jnp.dot(h.astype(wdt), w_ref[2][:hidden, :hidden],
                preferred_element_type=jnp.float32)
    g = jnp.maximum(g + b_ref[2:3, :hidden], 0.0)

    # dueling-folded head layer 2: q = g @ Wc + bc  (lane-dense 128-wide store)
    q = jnp.dot(g.astype(wdt), w_ref[3][:hidden, :],
                preferred_element_type=jnp.float32)
    out_ref[...] = (q + b_ref[3:4, :]).astype(out_ref.dtype)


# ---------------------------------------------------------------------------
# Wrapper
# ---------------------------------------------------------------------------
def _choose_tiling(batch, batch_tile, sublane):
    """Adaptive tile: padding at most one sublane group per tile; >=2 tiles for
    large batches so the v7x 'parallel' grid axis can shard across both TCs."""
    b = max(sublane, _round_up(batch, sublane))
    n_tiles = max(1, _cdiv(b, batch_tile))
    if n_tiles == 1 and b >= 2048:
        n_tiles = 2
    tb = _round_up(_cdiv(b, n_tiles), sublane)
    return tb, n_tiles * tb


def ddqn_forward(state, w_slab, b_slab, *, n_actions, hidden=32,
                 batch_tile=4096, use_bf16=False):
    """state: (B, n_states) f32; w_slab: (4, R, 128); b_slab: (4, 128) f32."""
    assert state.ndim == 2
    B, n_states = state.shape
    ns_pad = _round_up(n_states, 8)
    R = w_slab.shape[1]

    assert w_slab.shape[0] == 4 and w_slab.shape[2] == OUT_W, w_slab.shape
    assert b_slab.shape == (4, OUT_W), b_slab.shape
    assert hidden % 8 == 0 and hidden <= OUT_W, hidden
    assert ns_pad <= R and hidden <= R, (ns_pad, hidden, R)
    assert 1 <= n_actions <= OUT_W, n_actions

    sublane = 16 if use_bf16 else 8
    tb, Bp = _choose_tiling(B, batch_tile, sublane)

    if Bp != B or ns_pad != n_states:
        state = jnp.pad(state, ((0, Bp - B), (0, ns_pad - n_states)))

    if use_bf16:
        state = state.astype(jnp.bfloat16)
        w_slab = w_slab.astype(jnp.bfloat16)

    kernel = functools.partial(ddqn_kernel, ns_pad=ns_pad, hidden=hidden)

    q = pl.pallas_call(
        kernel,
        out_shape=jax.ShapeDtypeStruct((Bp, OUT_W), jnp.float32),
        grid_spec=pltpu.PrefetchScalarGridSpec(
            num_scalar_prefetch=0,
            grid=(Bp // tb,),
            in_specs=[
                pl.BlockSpec((tb, ns_pad), lambda i: (i, 0)),       # state tile
                pl.BlockSpec((4, R, OUT_W), lambda i: (0, 0, 0)),   # weights, resident
                pl.BlockSpec((4, OUT_W), lambda i: (0, 0)),         # biases, resident
            ],
            out_specs=pl.BlockSpec((tb, OUT_W), lambda i: (i, 0)),
        ),
        compiler_params=pltpu.CompilerParams(
            dimension_semantics=("parallel",),    # megacore-shardable on v7x
        ),
    )(state, w_slab, b_slab)

    return q[:B, :n_actions]


# ---------------------------------------------------------------------------
# Parameter init / packing / reference
# ---------------------------------------------------------------------------
def init_params(key, n_states, n_actions, hidden_size=32):
    half = hidden_size // 2
    ks = jax.random.split(key, 12)

    def lin(kw, kb, fan_in, fan_out):
        w = jax.random.normal(kw, (fan_in, fan_out), jnp.float32) * (1.0 / jnp.sqrt(fan_in))
        b = jax.random.normal(kb, (1, fan_out), jnp.float32) * 0.01
        return w, b

    w1, b1 = lin(ks[0], ks[1], n_states, hidden_size)
    w2, b2 = lin(ks[2], ks[3], hidden_size, hidden_size)
    wv1, bv1 = lin(ks[4], ks[5], hidden_size, half)
    wv2, bv2 = lin(ks[6], ks[7], half, 1)
    wa1, ba1 = lin(ks[8], ks[9], hidden_size, half)
    wa2, ba2 = lin(ks[10], ks[11], half, n_actions)

    return dict(w1=w1, b1=b1, w2=w2, b2=b2,
                wv1=wv1, bv1=bv1, wv2=wv2, bv2=bv2,
                wa1=wa1, ba1=ba1, wa2=wa2, ba2=ba2)


def pack_params(p, n_states, n_actions, hidden=32):
    """Pack the 12 Linear params into one (4, R, 128) weight slab + one (4, 128)
    bias slab, folding the dueling combine into slab row 3 (exact identity)."""
    half = hidden // 2
    ns_pad = _round_up(n_states, 8)
    R = max(hidden, ns_pad)

    assert hidden % 8 == 0 and hidden % 2 == 0 and hidden <= OUT_W, hidden
    assert 1 <= n_actions <= OUT_W, n_actions
    assert p["w1"].shape == (n_states, hidden)
    assert p["w2"].shape == (hidden, hidden)
    assert p["wv1"].shape == (hidden, half) and p["wa1"].shape == (hidden, half)
    assert p["wv2"].shape == (half, 1) and p["wa2"].shape == (half, n_actions)

    def pad_to(a, rows, cols):
        return jnp.pad(a, ((0, rows - a.shape[0]), (0, cols - a.shape[1])))

    # fused head-1 weight/bias: [Wv1 | Wa1], [bv1 | ba1]
    wh1 = jnp.concatenate([p["wv1"], p["wa1"]], axis=1)                 # (hidden, hidden)
    bh1 = jnp.concatenate([p["bv1"], p["ba1"]], axis=1)                 # (1, hidden)

    # dueling-folded head-2 weight/bias:  q = g @ Wc + bc
    wa2c = p["wa2"] - jnp.mean(p["wa2"], axis=1, keepdims=True)
    wc = jnp.concatenate(
        [jnp.broadcast_to(p["wv2"], (half, n_actions)), wa2c], axis=0)  # (hidden, n_actions)
    bc = p["bv2"] + p["ba2"] - jnp.mean(p["ba2"], axis=1, keepdims=True)  # (1, n_actions)

    w_slab = jnp.stack([
        pad_to(p["w1"], R, OUT_W),
        pad_to(p["w2"], R, OUT_W),
        pad_to(wh1, R, OUT_W),
        pad_to(wc, R, OUT_W),
    ])                                                                   # (4, R, 128)

    b_slab = jnp.concatenate([
        pad_to(p["b1"], 1, OUT_W),
        pad_to(p["b2"], 1, OUT_W),
        pad_to(bh1, 1, OUT_W),
        pad_to(bc, 1, OUT_W),
    ], axis=0)                                                           # (4, 128)

    return w_slab, b_slab


def ddqn_reference(state, p):
    relu = lambda t: jnp.maximum(t, 0.0)
    h = relu(state @ p["w1"] + p["b1"])
    h = relu(h @ p["w2"] + p["b2"])
    v = relu(h @ p["wv1"] + p["bv1"]) @ p["wv2"] + p["bv2"]
    a = relu(h @ p["wa1"] + p["ba1"]) @ p["wa2"] + p["ba2"]
    return v + a - jnp.mean(a, axis=-1, keepdims=True)


# ---------------------------------------------------------------------------
if __name__ == "__main__":
    B, n_states, n_actions, hidden = 8, 16, 4, 32

    key = jax.random.PRNGKey(0)
    k_state, k_params, k_big = jax.random.split(key, 3)
    params = init_params(k_params, n_states, n_actions, hidden)
    w_slab, b_slab = pack_params(params, n_states, n_actions, hidden)

    # --- small online-inference batch: exact f32 parity -------------------
    state = jax.random.normal(k_state, (B, n_states), jnp.float32)
    q = jax.block_until_ready(
        ddqn_forward(state, w_slab, b_slab, n_actions=n_actions, hidden=hidden))
    q_ref = ddqn_reference(state, params)
    assert q.shape == (B, n_actions)
    assert jnp.allclose(q, q_ref, atol=1e-5, rtol=1e-5), "f32 small-batch mismatch"

    # --- awkward replay-sized batch: exercises adaptive tiling / padding ---
    B2 = 520
    state2 = jax.random.normal(k_big, (B2, n_states), jnp.float32)
    q2 = jax.block_until_ready(
        ddqn_forward(state2, w_slab, b_slab, n_actions=n_actions, hidden=hidden,
                     batch_tile=256))
    q2_ref = ddqn_reference(state2, params)
    assert q2.shape == (B2, n_actions)
    assert jnp.allclose(q2, q2_ref, atol=1e-5, rtol=1e-5), "f32 replay-batch mismatch"

    # --- optional bf16 fast path (f32 accumulation), loose tolerance -------
    q3 = jax.block_until_ready(
        ddqn_forward(state2, w_slab, b_slab, n_actions=n_actions, hidden=hidden,
                     use_bf16=True))
    assert q3.shape == (B2, n_actions)
    assert jnp.allclose(q3, q2_ref, atol=1e-1, rtol=1e-1), "bf16 replay-batch mismatch"

    print("KERNEL_OK")
</pallas_src>

<mosaic_0001>
module attributes {stable_mosaic.version = 11 : i64} {
  func.func @ddqn_kernel(%arg0: i32, %arg1: memref<8x16xf32, #tpu.memory_space<vmem>>, %arg2: memref<4x32x128xf32, #tpu.memory_space<vmem>>, %arg3: memref<4x128xf32, #tpu.memory_space<vmem>>, %arg4: memref<8x128xf32, #tpu.memory_space<vmem>>) attributes {dimension_semantics = [#tpu.dimension_semantics<parallel>], iteration_bounds = array<i64: 1>, scalar_prefetch = 0 : i64, scratch_operands = 0 : i64, tpu.core_type = #tpu.core_type<tc>, window_params = [{transform_indices = @transform_0, window_bounds = array<i64: 8, 16>}, {pipeline_mode = #tpu.pipeline_mode<synchronous>, transform_indices = @transform_1, window_bounds = array<i64: 4, 32, 128>}, {pipeline_mode = #tpu.pipeline_mode<synchronous>, transform_indices = @transform_2, window_bounds = array<i64: 4, 128>}, {transform_indices = @transform_3, window_bounds = array<i64: 8, 128>}]} {
    %c0 = arith.constant 0 : index
    %c0_0 = arith.constant 0 : index
    %0 = vector.load %arg1[%c0, %c0_0] : memref<8x16xf32, #tpu.memory_space<vmem>>, vector<8x16xf32>
    %c0_1 = arith.constant 0 : index
    %c0_2 = arith.constant 0 : index
    %c0_3 = arith.constant 0 : index
    %1 = vector.load %arg2[%c0_1, %c0_2, %c0_3] : memref<4x32x128xf32, #tpu.memory_space<vmem>>, vector<1x32x128xf32>
    %2 = vector.shape_cast %1 : vector<1x32x128xf32> to vector<32x128xf32>
    %3 = vector.extract_strided_slice %2 {offsets = [0, 0], sizes = [16, 32], strides = [1, 1]} : vector<32x128xf32> to vector<16x32xf32>
    %cst = arith.constant dense<0.000000e+00> : vector<8x32xf32>
    %4 = tpu.matmul %0, %3, %cst {dimension_numbers = #tpu.dot_dimension_numbers<[1], [0], [0], [1], [0, 0, 1, 1], [], []>} : vector<8x16xf32>, vector<16x32xf32>, vector<8x32xf32> -> vector<8x32xf32>
    %c0_4 = arith.constant 0 : index
    %c0_5 = arith.constant 0 : index
    %5 = vector.load %arg3[%c0_4, %c0_5] : memref<4x128xf32, #tpu.memory_space<vmem>>, vector<1x32xf32>
    %6 = vector.broadcast %5 : vector<1x32xf32> to vector<8x32xf32>
    %7 = arith.addf %4, %6 : vector<8x32xf32>
    %cst_6 = arith.constant 0.000000e+00 : f32
    %8 = vector.broadcast %cst_6 : f32 to vector<8x32xf32>
    %9 = arith.maximumf %7, %8 : vector<8x32xf32>
    %c1 = arith.constant 1 : index
    %c0_7 = arith.constant 0 : index
    %c0_8 = arith.constant 0 : index
    %10 = vector.load %arg2[%c1, %c0_7, %c0_8] : memref<4x32x128xf32, #tpu.memory_space<vmem>>, vector<1x32x128xf32>
    %11 = vector.shape_cast %10 : vector<1x32x128xf32> to vector<32x128xf32>
    %12 = vector.extract_strided_slice %11 {offsets = [0, 0], sizes = [32, 32], strides = [1, 1]} : vector<32x128xf32> to vector<32x32xf32>
    %cst_9 = arith.constant dense<0.000000e+00> : vector<8x32xf32>
    %13 = tpu.matmul %9, %12, %cst_9 {dimension_numbers = #tpu.dot_dimension_numbers<[1], [0], [0], [1], [0, 0, 1, 1], [], []>} : vector<8x32xf32>, vector<32x32xf32>, vector<8x32xf32> -> vector<8x32xf32>
    %c1_10 = arith.constant 1 : index
    %c0_11 = arith.constant 0 : index
    %14 = vector.load %arg3[%c1_10, %c0_11] : memref<4x128xf32, #tpu.memory_space<vmem>>, vector<1x32xf32>
    %15 = vector.broadcast %14 : vector<1x32xf32> to vector<8x32xf32>
    %16 = arith.addf %13, %15 : vector<8x32xf32>
    %cst_12 = arith.constant 0.000000e+00 : f32
    %17 = vector.broadcast %cst_12 : f32 to vector<8x32xf32>
    %18 = arith.maximumf %16, %17 : vector<8x32xf32>
    %c2 = arith.constant 2 : index
    %c0_13 = arith.constant 0 : index
    %c0_14 = arith.constant 0 : index
    %19 = vector.load %arg2[%c2, %c0_13, %c0_14] : memref<4x32x128xf32, #tpu.memory_space<vmem>>, vector<1x32x128xf32>
    %20 = vector.shape_cast %19 : vector<1x32x128xf32> to vector<32x128xf32>
    %21 = vector.extract_strided_slice %20 {offsets = [0, 0], sizes = [32, 32], strides = [1, 1]} : vector<32x128xf32> to vector<32x32xf32>
    %cst_15 = arith.constant dense<0.000000e+00> : vector<8x32xf32>
    %22 = tpu.matmul %18, %21, %cst_15 {dimension_numbers = #tpu.dot_dimension_numbers<[1], [0], [0], [1], [0, 0, 1, 1], [], []>} : vector<8x32xf32>, vector<32x32xf32>, vector<8x32xf32> -> vector<8x32xf32>
    %c2_16 = arith.constant 2 : index
    %c0_17 = arith.constant 0 : index
    %23 = vector.load %arg3[%c2_16, %c0_17] : memref<4x128xf32, #tpu.memory_space<vmem>>, vector<1x32xf32>
    %24 = vector.broadcast %23 : vector<1x32xf32> to vector<8x32xf32>
    %25 = arith.addf %22, %24 : vector<8x32xf32>
    %cst_18 = arith.constant 0.000000e+00 : f32
    %26 = vector.broadcast %cst_18 : f32 to vector<8x32xf32>
    %27 = arith.maximumf %25, %26 : vector<8x32xf32>
    %c3 = arith.constant 3 : index
    %c0_19 = arith.constant 0 : index
    %c0_20 = arith.constant 0 : index
    %28 = vector.load %arg2[%c3, %c0_19, %c0_20] : memref<4x32x128xf32, #tpu.memory_space<vmem>>, vector<1x32x128xf32>
    %29 = vector.shape_cast %28 : vector<1x32x128xf32> to vector<32x128xf32>
    %cst_21 = arith.constant dense<0.000000e+00> : vector<8x128xf32>
    %30 = tpu.matmul %27, %29, %cst_21 {dimension_numbers = #tpu.dot_dimension_numbers<[1], [0], [0], [1], [0, 0, 1, 1], [], []>} : vector<8x32xf32>, vector<32x128xf32>, vector<8x128xf32> -> vector<8x128xf32>
    %c3_22 = arith.constant 3 : index
    %c0_23 = arith.constant 0 : index
    %31 = vector.load %arg3[%c3_22, %c0_23] : memref<4x128xf32, #tpu.memory_space<vmem>>, vector<1x128xf32>
    %32 = vector.broadcast %31 : vector<1x128xf32> to vector<8x128xf32>
    %33 = arith.addf %30, %32 : vector<8x128xf32>
    %c0_24 = arith.constant 0 : index
    %c0_25 = arith.constant 0 : index
    %34 = vector.load %arg4[%c0_24, %c0_25] : memref<8x128xf32, #tpu.memory_space<vmem>>, vector<8x128xf32>
    tpu.vector_store %arg4[%c0_24, %c0_25], %33 {strides = array<i32>} : memref<8x128xf32, #tpu.memory_space<vmem>>, vector<8x128xf32>,
    return
  }
  func.func @transform_0(%arg0: i32) -> (i32, i32) {
    %c0_i32 = arith.constant 0 : i32
    %c0_i32_0 = arith.constant 0 : i32
    return %arg0, %c0_i32 : i32, i32
  }
  func.func @transform_1(%arg0: i32) -> (i32, i32, i32) {
    %c0_i32 = arith.constant 0 : i32
    %c0_i32_0 = arith.constant 0 : i32
    %c0_i32_1 = arith.constant 0 : i32
    %c0_i32_2 = arith.constant 0 : i32
    return %c0_i32, %c0_i32_0, %c0_i32_1 : i32, i32, i32
  }
  func.func @transform_2(%arg0: i32) -> (i32, i32) {
    %c0_i32 = arith.constant 0 : i32
    %c0_i32_0 = arith.constant 0 : i32
    %c0_i32_1 = arith.constant 0 : i32
    return %c0_i32, %c0_i32_0 : i32, i32
  }
  func.func @transform_3(%arg0: i32) -> (i32, i32) {
    %c0_i32 = arith.constant 0 : i32
    %c0_i32_0 = arith.constant 0 : i32
    return %arg0, %c0_i32 : i32, i32
  }
}

</mosaic_0001>

<bundles_post_ra>
// kernel: tpu_custom_call.1
= control target key start
LH: loop header
LB: loop body
LE: loop exit
PB: predicated region body
PF: predicated region fallthrough
CT: control target
= control target key end

     0   :  { %8 = vsyncpa [#allocation3], 0  ;;  %s357_s0 = inlined_call_operand.hbm [shape: f32[8,16], index: 0, kind: input, shape index: {}]   ;;  %s358_s1 = inlined_call_operand.hbm [shape: f32[4,32,128], index: 1, kind: input, shape index: {}]   ;;  %s359_s2 = inlined_call_operand.hbm [shape: f32[4,128], index: 2, kind: input, shape index: {}]   ;;  %s360_s3 = inlined_call_operand.hbm [shape: f32[8,128], index: 3, kind: output, shape index: {}]  }
   0x1   :  { %9 = vsyncpa [#allocation6], 0  ;;  %s26_s14 = sshll.u32 %s358_s1, 4  ;;  %s27_s14 = int_to_ptr.hbm [resolvable:$true] %s26_s14 }
   0x2   :  { %10 = vsyncpa [#allocation4], 0  ;;  %s316_s15 = smov [#allocation5]   ;;  %s16_s19 = sshll.u32 %s357_s0, 4  ;;  %s17_s19 = int_to_ptr.hbm [resolvable:$true] %s16_s19 }
   0x3   :  { %s28_s16 = sshll.u32 %s316_s15, 4  ;;  %s317_s20 = smov 128   ;;  %s29_s16 = int_to_ptr.vmem [resolvable:$true] %s28_s16 }
   0x4   :  { %s318_s21 = smov 8   ;;  %s319_s22 = smov [#allocation2]  }
   0x5   :  { %34 = dma.hbm_to_vmem [thread:$0]  %s27_s14, 2048, %s29_s16, [#allocation6], %s317_s20, %s317_s20, %s318_s21  }
   0x6   :  { %s18_s23 = sshll.u32 %s319_s22, 4  ;;  %s40_s26 = sshll.u32 %s359_s2, 4  ;;  %s19_s23 = int_to_ptr.vmem [resolvable:$true] %s18_s23  ;;  %s41_s26 = int_to_ptr.hbm [resolvable:$true] %s40_s26 }
   0x7   :  { %21 = dma.hbm_to_vmem [thread:$0]  %s17_s19, 128, %s19_s23, [#allocation3]  }
   0x8   :  { %s320_s1 = smov [#allocation7]  }
   0x9   :  { %s42_s27 = sshll.u32 %s320_s1, 4  ;;  %s43_s27 = int_to_ptr.vmem [resolvable:$true] %s42_s27 }
   0xa   :  { %45 = dma.hbm_to_vmem [thread:$0]  %s41_s26, 64, %s43_s27, [#allocation6]  }
   0xb   :  { %310 = dma.done.wait [#allocation3], 128  }
   0xc   :  { %311 = vsyncadd [#allocation3], 4294967168 }
   0xd   :  { %312 = dma.done.wait [#allocation6], 2112  }
   0xe   :  { %313 = vsyncadd [#allocation6], 4294965184  ;;  %v60_v0 = vld [vmem:[#allocation5 + $0x8] sm:$0xff]  ;;  %v59_v1 = vld [vmem:[#allocation5] sm:$0xff]  ;;  %vm63_vm0 = vcmask 130048   ;;  %vm95_vm1 = vcmask 261120  }
   0xf   :  { %81 = vmatpush.msra.mxu0 %v60_v0  ;;  %v58_v2 = vld [vmem:[#allocation2] sm:$0xff]  ;;  %v91_v4 = vld [vmem:[#allocation5 + $0x30] sm:$0xff]  ;;  %v90_v5 = vld [vmem:[#allocation5 + $0x28] sm:$0xff]  ;;  %s321_s0 = smov [#allocation8]   ;;  %s189_s30 = sshll.u32 %s360_s3, 4  ;;  %s190_s30 = int_to_ptr.hbm [resolvable:$true] %s189_s30 }
  0x10   :  { %v92_v3 = vld [vmem:[#allocation5 + $0x38] sm:$0xff]  ;;  %v89_v6 = vld [vmem:[#allocation5 + $0x20] sm:$0xff]  ;;  %v123_v12 = vld [vmem:[#allocation5 + $0x50] sm:$0xff]  ;;  %s187_s2 = sshll.u32 %s321_s0, 4  ;;  %s188_s2 = int_to_ptr.vmem [resolvable:$true] %s187_s2 }
  0x11   :  { %111 = vmatpush.msra.mxu1 %v92_v3  ;;  %82 = vmatpush.msra.mxu0 %v59_v1  ;;  %v124_v7 = vld [vmem:[#allocation5 + $0x58] sm:$0xff]  ;;  %v210_v8 = vld [vmem:[#allocation7] ss:$0 sm:$0xff]  ;;  %v122_v13 = vld [vmem:[#allocation5 + $0x48] sm:$0xff] }
  0x12   :  { %200 = vmatmul.msk.f32.vlgmr.msra.gmra.mxu0 %vm63_vm0, %v58_v2  ;;  %142 = vmatpush.msra.mxu2 %v124_v7  ;;  %v121_v14 = vld [vmem:[#allocation5 + $0x40] sm:$0xff]  ;;  %v155_v15 = vld [vmem:[#allocation5 + $0x78] sm:$0xff]  ;;  %v154_v20 = vld [vmem:[#allocation5 + $0x70] sm:$0xff] }
  0x13   :  { %112 = vmatpush.msra.mxu1 %v91_v4  ;;  %173 = vmatpush.msra.mxu3 %v155_v15  ;;  %v211_v16 = vld [vmem:[#allocation7 + $0x1] ss:$0 sm:$0xff]  ;;  %v153_v21 = vld [vmem:[#allocation5 + $0x68] sm:$0xff]  ;;  %v212_v23 = vld [vmem:[#allocation7 + $0x2] ss:$0 sm:$0xff] }
  0x14   :  { %143 = vmatpush.msra.mxu2 %v123_v12  ;;  %v152_v22 = vld [vmem:[#allocation5 + $0x60] sm:$0xff] }
  0x15   :  { %113 = vmatpush.msra.mxu1 %v90_v5  ;;  %174 = vmatpush.msra.mxu3 %v154_v20  ;;  %v213_v27 = vld [vmem:[#allocation7 + $0x3] ss:$0 sm:$0xff] }
  0x16   :  { %144 = vmatpush.msra.mxu2 %v122_v13 }
  0x17   :  { %114 = vmatpush.msra.mxu1 %v89_v6  ;;  %175 = vmatpush.msra.mxu3 %v153_v21 }
  0x18   :  { %145 = vmatpush.msra.mxu2 %v121_v14 }
  0x19   :  { %176 = vmatpush.msra.mxu3 %v152_v22 }
  0x8f   :  { %v84_v9 = vpop.f32.mrf.mxu0 }
  0x90   :  { %v85_v10 = vadd.f32 %v210_v8, %v84_v9 }
  0x92   :  { %v87_v11 = vmax.f32 %v85_v10, 0.0 }
  0x94   :  { %201 = vmatmul.msk.f32.vlgmr.msra.gmra.mxu1 %vm95_vm1, %v87_v11 }
 0x111   :  { %v116_v17 = vpop.f32.mrf.mxu1 }
 0x112   :  { %v117_v18 = vadd.f32 %v211_v16, %v116_v17 }
 0x114   :  { %v119_v19 = vmax.f32 %v117_v18, 0.0 }
 0x116   :  { %202 = vmatmul.msk.f32.vlgmr.msra.gmra.mxu2 %vm95_vm1, %v119_v19 }
 0x199   :  { %v147_v24 = vpop.f32.mrf.mxu2 }
 0x19a   :  { %v148_v25 = vadd.f32 %v212_v23, %v147_v24 }
 0x19c   :  { %v150_v26 = vmax.f32 %v148_v25, 0.0 }
 0x19e   :  { %203 = vmatmul.msk.f32.vlgmr.msra.gmra.mxu3 %vm95_vm1, %v150_v26 }
 0x221   :  { %v178_v28 = vpop.f32.mrf.mxu3 }
 0x222   :  { %v179_v29 = vadd.f32 %v213_v27, %v178_v28 }
 0x224   :  { %181 = vst [vmem:[#allocation8] sm:$0xff] %v179_v29 }
 0x225   :  { %192 = dma.vmem_to_hbm [thread:$0]  %s188_s2, 128, %s190_s30, [#allocation4]  }
 0x226   :  { %314 = dma.done.wait [#allocation4], 128  }
 0x227   :  { %315 = vsyncadd [#allocation4], 4294967168 }
 0x228   :  { %197 = vsyncpa [#allocation3], 1 }
 0x229   :  { %198 = vsyncpa [#allocation6], 1 }
 0x22a   :  { %199 = vsyncpa [#allocation4], 1 }

</bundles_post_ra>
